<compile_context>
chip_gen: v7x
topology: tpu7x:2x2x1
jax: 0.10.0
libtpu: 0.0.40
codegen_flags: <defaults>
</compile_context>

<pallas_src>
import jax
import jax.numpy as jnp
from jax.experimental import pallas as pl
from jax.experimental.pallas import tpu as pltpu


# ---------------------------------------------------------------------------
# Kernels
# ---------------------------------------------------------------------------

def _ffn_resident_kernel(x_ref, w1_ref, b1_ref, w2_ref, b2_ref, o_ref):
    """Whole FFN on one token tile; w1/b1/w2/b2 are VMEM-resident."""
    h = jnp.dot(x_ref[...], w1_ref[...], preferred_element_type=jnp.float32)
    h = jnp.maximum(h + b1_ref[...].astype(jnp.float32), 0.0)   # ReLU (f32)
    y = jnp.dot(h.astype(w2_ref.dtype), w2_ref[...],
                preferred_element_type=jnp.float32)
    y = y + b2_ref[...].astype(jnp.float32)
    # Dropout: identity at inference time.
    o_ref[...] = y.astype(o_ref.dtype)


def _ffn_ktiled_kernel(x_ref, w1_ref, b1_ref, w2_ref, b2_ref, o_ref, acc_ref):
    """Hidden-dim tiled FFN: y = sum_k relu(x @ w1[:,k] + b1[k]) @ w2[k,:] + b2."""
    k = pl.program_id(1)

    @pl.when(k == 0)
    def _():
        acc_ref[...] = jnp.zeros_like(acc_ref)

    h = jnp.dot(x_ref[...], w1_ref[...], preferred_element_type=jnp.float32)
    h = jnp.maximum(h + b1_ref[...].astype(jnp.float32), 0.0)
    acc_ref[...] += jnp.dot(h.astype(w2_ref.dtype), w2_ref[...],
                            preferred_element_type=jnp.float32)

    @pl.when(k == pl.num_programs(1) - 1)
    def _():
        y = acc_ref[...] + b2_ref[...].astype(jnp.float32)
        # Dropout: identity at inference time.
        o_ref[...] = y.astype(o_ref.dtype)


# ---------------------------------------------------------------------------
# Wrapper helpers
# ---------------------------------------------------------------------------

def _round_up(n, m):
    return ((n + m - 1) // m) * m


def _cdiv(a, b):
    return (a + b - 1) // b


def _vmem_capacity_bytes():
    try:
        cap = getattr(pltpu.get_tpu_info(), "vmem_capacity_bytes", None)
        if cap:
            return int(cap)
    except Exception:
        pass
    return 64 * 2 ** 20  # conservative default: v7x per-TensorCore VMEM


def _pad_cast_2d(a, target_shape, dtype):
    """Cast + zero-pad a 2-D array; no copies when already conforming."""
    if a.dtype != dtype:
        a = a.astype(dtype)
    pads = tuple((0, t - s) for s, t in zip(a.shape, target_shape))
    if any(hi for _, hi in pads):
        a = jnp.pad(a, pads)
    return a


def _spec(shape, index_map, *, buffers=None):
    """BlockSpec, optionally with an explicit pipeline buffer count."""
    if buffers is not None and hasattr(pl, "Buffered"):
        try:
            return pl.BlockSpec(shape, index_map,
                                pipeline_mode=pl.Buffered(buffers))
        except TypeError:
            pass
    return pl.BlockSpec(shape, index_map)


# ---------------------------------------------------------------------------
# Public entry point
# ---------------------------------------------------------------------------

def feedforward(x, w1, b1, w2, b2, *, tm=512, compute_dtype=jnp.bfloat16,
                hidden_block=None):
    """FeedForward: relu(x @ w1 + b1) @ w2 + b2 (dropout = inference identity).

    x: (B, T, D); w1: (D, H); b1: (H,)/(1,H); w2: (H, D); b2: (D,)/(1,D).
    """
    B, T, D = x.shape
    H = w1.shape[1]
    M = B * T

    Dp = _round_up(D, 128)          # lane-dense embedding width
    Hp = _round_up(H, 128)          # lane-dense hidden width

    cdt = jnp.dtype(compute_dtype)
    csz = cdt.itemsize
    osz = jnp.dtype(x.dtype).itemsize

    # Operands: cast to MXU dtype; zero-pad only when D/H not lane-aligned.
    xp = _pad_cast_2d(x.reshape(M, D), (M, Dp), cdt)
    w1p = _pad_cast_2d(w1, (Dp, Hp), cdt)
    b1p = _pad_cast_2d(b1.reshape(1, -1), (1, Hp), cdt)
    w2p = _pad_cast_2d(w2, (Hp, Dp), cdt)
    b2p = _pad_cast_2d(b2.reshape(1, -1), (1, Dp), cdt)

    # Per-chip VMEM budget (<= ~85% of physical, <= 96 MiB on v5e/v6e).
    budget = min(int(0.85 * _vmem_capacity_bytes()), 96 * 2 ** 20)

    # Path selection: fully-resident weights vs hidden-dim K-tiling.
    res_fixed = (2 * Dp * Hp + Hp + Dp) * csz                  # single-buffered weights
    res_row = 2 * Dp * csz + 2 * Dp * osz + (Hp + Dp) * 4      # per token row (f32 hidden)
    use_ktile = hidden_block is not None or (res_fixed + 256 * res_row > budget)

    if use_ktile:
        n128 = Hp // 128
        if hidden_block is not None:
            kb = min(max(128, _round_up(hidden_block, 128)), Hp)
            while Hp % kb:
                kb -= 128
        else:
            kb = 128
            for j in range(n128, 0, -1):
                if n128 % j:
                    continue
                cand = 128 * j
                if 2 * (2 * Dp * cand + cand) * csz * 3 <= budget:
                    kb = cand
                    break
        fixed = 2 * (2 * Dp * kb + kb) * csz + Dp * csz        # dbl-buffered slabs + b2
        row = 2 * Dp * csz + 2 * Dp * osz + (kb + 2 * Dp) * 4  # x/o tiles, hidden, acc
    else:
        kb = None
        fixed = res_fixed
        row = res_row

    # Token tile: as large as VMEM allows; split into >=2 steps (v7x has 2 TCs).
    tm_cap = max(8, (budget - fixed) // row)
    tm = max(8, min(int(tm), int(tm_cap)))
    tm = min(tm, _round_up(_cdiv(M, 2), 8))
    tm = max(8, (tm // 8) * 8)
    grid_m = _cdiv(M, tm)            # partial last tile: stores masked by Pallas

    need = fixed + tm * row
    vmem_limit = int(min(budget, max(32 * 2 ** 20, need + need // 4 + (2 << 20))))

    cost = pl.CostEstimate(
        flops=4 * M * Dp * Hp,
        transcendentals=0,
        bytes_accessed=M * Dp * (csz + osz) + (2 * Dp * Hp + Hp + Dp) * csz,
    )

    def launch(use_buffered):
        res_buf = 1 if use_buffered else None
        if use_ktile:
            kernel = _ffn_ktiled_kernel
            grid = (grid_m, Hp // kb)
            in_specs = [
                pl.BlockSpec((tm, Dp), lambda i, k: (i, 0)),    # x tile (held over k)
                pl.BlockSpec((Dp, kb), lambda i, k: (0, k)),    # w1 slab (streamed)
                pl.BlockSpec((1, kb), lambda i, k: (0, k)),     # b1 slab (streamed)
                pl.BlockSpec((kb, Dp), lambda i, k: (k, 0)),    # w2 slab (streamed)
                _spec((1, Dp), lambda i, k: (0, 0), buffers=res_buf),  # b2 (resident)
            ]
            out_specs = pl.BlockSpec((tm, Dp), lambda i, k: (i, 0))
            scratch = [pltpu.VMEM((tm, Dp), jnp.float32)]
            semantics = ("parallel", "arbitrary")
        else:
            kernel = _ffn_resident_kernel
            grid = (grid_m,)
            in_specs = [
                pl.BlockSpec((tm, Dp), lambda i: (i, 0)),             # x tile (pipelined)
                _spec((Dp, Hp), lambda i: (0, 0), buffers=res_buf),   # w1 (resident)
                _spec((1, Hp), lambda i: (0, 0), buffers=res_buf),    # b1 (resident)
                _spec((Hp, Dp), lambda i: (0, 0), buffers=res_buf),   # w2 (resident)
                _spec((1, Dp), lambda i: (0, 0), buffers=res_buf),    # b2 (resident)
            ]
            out_specs = pl.BlockSpec((tm, Dp), lambda i: (i, 0))
            scratch = []
            semantics = ("parallel",)

        return pl.pallas_call(
            kernel,
            out_shape=jax.ShapeDtypeStruct((M, Dp), x.dtype),
            grid_spec=pltpu.PrefetchScalarGridSpec(
                num_scalar_prefetch=0,
                grid=grid,
                in_specs=in_specs,
                out_specs=out_specs,
                scratch_shapes=scratch,
            ),
            compiler_params=pltpu.CompilerParams(
                dimension_semantics=semantics,
                vmem_limit_bytes=vmem_limit,
            ),
            cost_estimate=cost,
        )(xp, w1p, b1p, w2p, b2p)

    try:
        out2d = launch(use_buffered=True)
    except Exception:
        # Conservative fallback if single-buffered pipeline_mode is unsupported.
        out2d = launch(use_buffered=False)

    if Dp != D:
        out2d = out2d[:, :D]
    return out2d.reshape(B, T, D)


# ---------------------------------------------------------------------------
# Self-test
# ---------------------------------------------------------------------------

def _reference(x, w1, b1, w2, b2, dtype):
    D = x.shape[-1]
    xr = x.reshape(-1, D).astype(dtype)
    h = jnp.dot(xr, w1.astype(dtype), preferred_element_type=jnp.float32)
    h = jnp.maximum(h + b1.reshape(1, -1).astype(dtype).astype(jnp.float32), 0.0)
    y = jnp.dot(h.astype(dtype), w2.astype(dtype),
                preferred_element_type=jnp.float32)
    y = y + b2.reshape(1, -1).astype(dtype).astype(jnp.float32)
    return y.reshape(x.shape).astype(x.dtype)


if __name__ == "__main__":
    key = jax.random.PRNGKey(0)
    k_a, k_b = jax.random.split(key)

    def make_inputs(k, n_embd, B=2, T=8):
        H = 4 * n_embd
        kx, kw1, kb1, kw2, kb2 = jax.random.split(k, 5)
        s1, s2 = 1.0 / n_embd ** 0.5, 1.0 / H ** 0.5
        x = jax.random.normal(kx, (B, T, n_embd), jnp.float32)
        w1 = jax.random.uniform(kw1, (n_embd, H), jnp.float32, -s1, s1)
        b1 = jax.random.uniform(kb1, (H,), jnp.float32, -s1, s1)
        w2 = jax.random.uniform(kw2, (H, n_embd), jnp.float32, -s2, s2)
        b2 = jax.random.uniform(kb2, (n_embd,), jnp.float32, -s2, s2)
        return x, w1, b1, w2, b2

    # Test A: n_embd=32 (D padded 32->128), default bf16 MXU compute,
    # resident-weight kernel, 2 token-tile grid steps.
    x, w1, b1, w2, b2 = make_inputs(k_a, 32)
    out = feedforward(x, w1, b1, w2, b2)
    jax.block_until_ready(out)
    ref = _reference(x, w1, b1, w2, b2, jnp.bfloat16)
    assert out.shape == x.shape
    assert jnp.allclose(out, ref, atol=1e-2, rtol=1e-2), "bf16 resident path mismatch"

    # Test B: n_embd=128 (no padding), f32 compute, hidden-dim K-tiled kernel
    # (2 token tiles x 2 hidden slabs).
    x, w1, b1, w2, b2 = make_inputs(k_b, 128)
    out = feedforward(x, w1, b1, w2, b2, compute_dtype=jnp.float32,
                      hidden_block=256)
    jax.block_until_ready(out)
    ref = _reference(x, w1, b1, w2, b2, jnp.float32)
    assert jnp.allclose(out, ref, atol=1e-4, rtol=1e-4), "f32 K-tiled path mismatch"

    print("KERNEL_OK")
</pallas_src>

<mosaic_0001>
module attributes {stable_mosaic.version = 11 : i64} {
  func.func @_ffn_resident_kernel(%arg0: i32, %arg1: memref<8x128xbf16, #tpu.memory_space<vmem>>, %arg2: memref<128x128xbf16, #tpu.memory_space<vmem>>, %arg3: memref<1x128xbf16, #tpu.memory_space<vmem>>, %arg4: memref<128x128xbf16, #tpu.memory_space<vmem>>, %arg5: memref<1x128xbf16, #tpu.memory_space<vmem>>, %arg6: memref<8x128xf32, #tpu.memory_space<vmem>>) attributes {dimension_semantics = [#tpu.dimension_semantics<parallel>], iteration_bounds = array<i64: 2>, scalar_prefetch = 0 : i64, scratch_operands = 0 : i64, tpu.core_type = #tpu.core_type<tc>, window_params = [{transform_indices = @transform_0, window_bounds = array<i64: 8, 128>}, {pipeline_mode = #tpu.pipeline_mode<synchronous>, transform_indices = @transform_1, window_bounds = array<i64: 128, 128>}, {pipeline_mode = #tpu.pipeline_mode<synchronous>, transform_indices = @transform_2, window_bounds = array<i64: 1, 128>}, {pipeline_mode = #tpu.pipeline_mode<synchronous>, transform_indices = @transform_3, window_bounds = array<i64: 128, 128>}, {pipeline_mode = #tpu.pipeline_mode<synchronous>, transform_indices = @transform_4, window_bounds = array<i64: 1, 128>}, {transform_indices = @transform_5, window_bounds = array<i64: 8, 128>}]} {
    %c0 = arith.constant 0 : index
    %c0_0 = arith.constant 0 : index
    %0 = vector.load %arg1[%c0, %c0_0] : memref<8x128xbf16, #tpu.memory_space<vmem>>, vector<8x128xbf16>
    %c0_1 = arith.constant 0 : index
    %c0_2 = arith.constant 0 : index
    %1 = vector.load %arg2[%c0_1, %c0_2] : memref<128x128xbf16, #tpu.memory_space<vmem>>, vector<128x128xbf16>
    %cst = arith.constant dense<0.000000e+00> : vector<8x128xf32>
    %2 = tpu.matmul %0, %1, %cst {dimension_numbers = #tpu.dot_dimension_numbers<[1], [0], [0], [1], [0, 0, 1, 1], [], []>} : vector<8x128xbf16>, vector<128x128xbf16>, vector<8x128xf32> -> vector<8x128xf32>
    %c0_3 = arith.constant 0 : index
    %c0_4 = arith.constant 0 : index
    %3 = vector.load %arg3[%c0_3, %c0_4] : memref<1x128xbf16, #tpu.memory_space<vmem>>, vector<1x128xbf16>
    %4 = arith.extf %3 : vector<1x128xbf16> to vector<1x128xf32>
    %5 = vector.broadcast %4 : vector<1x128xf32> to vector<8x128xf32>
    %6 = arith.addf %2, %5 : vector<8x128xf32>
    %cst_5 = arith.constant 0.000000e+00 : f32
    %7 = vector.broadcast %cst_5 : f32 to vector<8x128xf32>
    %8 = arith.maximumf %6, %7 : vector<8x128xf32>
    %9 = arith.truncf %8 : vector<8x128xf32> to vector<8x128xbf16>
    %c0_6 = arith.constant 0 : index
    %c0_7 = arith.constant 0 : index
    %10 = vector.load %arg4[%c0_6, %c0_7] : memref<128x128xbf16, #tpu.memory_space<vmem>>, vector<128x128xbf16>
    %cst_8 = arith.constant dense<0.000000e+00> : vector<8x128xf32>
    %11 = tpu.matmul %9, %10, %cst_8 {dimension_numbers = #tpu.dot_dimension_numbers<[1], [0], [0], [1], [0, 0, 1, 1], [], []>} : vector<8x128xbf16>, vector<128x128xbf16>, vector<8x128xf32> -> vector<8x128xf32>
    %c0_9 = arith.constant 0 : index
    %c0_10 = arith.constant 0 : index
    %12 = vector.load %arg5[%c0_9, %c0_10] : memref<1x128xbf16, #tpu.memory_space<vmem>>, vector<1x128xbf16>
    %13 = arith.extf %12 : vector<1x128xbf16> to vector<1x128xf32>
    %14 = vector.broadcast %13 : vector<1x128xf32> to vector<8x128xf32>
    %15 = arith.addf %11, %14 : vector<8x128xf32>
    %c0_11 = arith.constant 0 : index
    %c0_12 = arith.constant 0 : index
    %16 = vector.load %arg6[%c0_11, %c0_12] : memref<8x128xf32, #tpu.memory_space<vmem>>, vector<8x128xf32>
    tpu.vector_store %arg6[%c0_11, %c0_12], %15 {strides = array<i32>} : memref<8x128xf32, #tpu.memory_space<vmem>>, vector<8x128xf32>,
    return
  }
  func.func @transform_0(%arg0: i32) -> (i32, i32) {
    %c0_i32 = arith.constant 0 : i32
    %c0_i32_0 = arith.constant 0 : i32
    return %arg0, %c0_i32 : i32, i32
  }
  func.func @transform_1(%arg0: i32) -> (i32, i32) {
    %c0_i32 = arith.constant 0 : i32
    %c0_i32_0 = arith.constant 0 : i32
    %c0_i32_1 = arith.constant 0 : i32
    return %c0_i32, %c0_i32_0 : i32, i32
  }
  func.func @transform_2(%arg0: i32) -> (i32, i32) {
    %c0_i32 = arith.constant 0 : i32
    %c0_i32_0 = arith.constant 0 : i32
    %c0_i32_1 = arith.constant 0 : i32
    return %c0_i32, %c0_i32_0 : i32, i32
  }
  func.func @transform_3(%arg0: i32) -> (i32, i32) {
    %c0_i32 = arith.constant 0 : i32
    %c0_i32_0 = arith.constant 0 : i32
    %c0_i32_1 = arith.constant 0 : i32
    return %c0_i32, %c0_i32_0 : i32, i32
  }
  func.func @transform_4(%arg0: i32) -> (i32, i32) {
    %c0_i32 = arith.constant 0 : i32
    %c0_i32_0 = arith.constant 0 : i32
    %c0_i32_1 = arith.constant 0 : i32
    return %c0_i32, %c0_i32_0 : i32, i32
  }
  func.func @transform_5(%arg0: i32) -> (i32, i32) {
    %c0_i32 = arith.constant 0 : i32
    %c0_i32_0 = arith.constant 0 : i32
    return %arg0, %c0_i32 : i32, i32
  }
}

module attributes {stable_mosaic.version = 11 : i64} {
  func.func @_ffn_resident_kernel(%arg0: i32, %arg1: memref<8x128xbf16, #tpu.memory_space<vmem>>, %arg2: memref<128x128xbf16, #tpu.memory_space<vmem>>, %arg3: memref<1x128xbf16, #tpu.memory_space<vmem>>, %arg4: memref<128x128xbf16, #tpu.memory_space<vmem>>, %arg5: memref<1x128xbf16, #tpu.memory_space<vmem>>, %arg6: memref<8x128xf32, #tpu.memory_space<vmem>>) attributes {dimension_semantics = [#tpu.dimension_semantics<parallel>], iteration_bounds = array<i64: 2>, scalar_prefetch = 0 : i64, scratch_operands = 0 : i64, tpu.core_type = #tpu.core_type<tc>, window_params = [{transform_indices = @transform_0, window_bounds = array<i64: 8, 128>}, {pipeline_mode = #tpu.pipeline_mode<synchronous>, transform_indices = @transform_1, window_bounds = array<i64: 128, 128>}, {pipeline_mode = #tpu.pipeline_mode<synchronous>, transform_indices = @transform_2, window_bounds = array<i64: 1, 128>}, {pipeline_mode = #tpu.pipeline_mode<synchronous>, transform_indices = @transform_3, window_bounds = array<i64: 128, 128>}, {pipeline_mode = #tpu.pipeline_mode<synchronous>, transform_indices = @transform_4, window_bounds = array<i64: 1, 128>}, {transform_indices = @transform_5, window_bounds = array<i64: 8, 128>}]} {
    %c0 = arith.constant 0 : index
    %c0_0 = arith.constant 0 : index
    %0 = vector.load %arg1[%c0, %c0_0] : memref<8x128xbf16, #tpu.memory_space<vmem>>, vector<8x128xbf16>
    %c0_1 = arith.constant 0 : index
    %c0_2 = arith.constant 0 : index
    %1 = vector.load %arg2[%c0_1, %c0_2] : memref<128x128xbf16, #tpu.memory_space<vmem>>, vector<128x128xbf16>
    %cst = arith.constant dense<0.000000e+00> : vector<8x128xf32>
    %2 = tpu.matmul %0, %1, %cst {dimension_numbers = #tpu.dot_dimension_numbers<[1], [0], [0], [1], [0, 0, 1, 1], [], []>} : vector<8x128xbf16>, vector<128x128xbf16>, vector<8x128xf32> -> vector<8x128xf32>
    %c0_3 = arith.constant 0 : index
    %c0_4 = arith.constant 0 : index
    %3 = vector.load %arg3[%c0_3, %c0_4] : memref<1x128xbf16, #tpu.memory_space<vmem>>, vector<1x128xbf16>
    %4 = arith.extf %3 : vector<1x128xbf16> to vector<1x128xf32>
    %5 = vector.broadcast %4 : vector<1x128xf32> to vector<8x128xf32>
    %6 = arith.addf %2, %5 : vector<8x128xf32>
    %cst_5 = arith.constant 0.000000e+00 : f32
    %7 = vector.broadcast %cst_5 : f32 to vector<8x128xf32>
    %8 = arith.maximumf %6, %7 : vector<8x128xf32>
    %9 = arith.truncf %8 : vector<8x128xf32> to vector<8x128xbf16>
    %c0_6 = arith.constant 0 : index
    %c0_7 = arith.constant 0 : index
    %10 = vector.load %arg4[%c0_6, %c0_7] : memref<128x128xbf16, #tpu.memory_space<vmem>>, vector<128x128xbf16>
    %cst_8 = arith.constant dense<0.000000e+00> : vector<8x128xf32>
    %11 = tpu.matmul %9, %10, %cst_8 {dimension_numbers = #tpu.dot_dimension_numbers<[1], [0], [0], [1], [0, 0, 1, 1], [], []>} : vector<8x128xbf16>, vector<128x128xbf16>, vector<8x128xf32> -> vector<8x128xf32>
    %c0_9 = arith.constant 0 : index
    %c0_10 = arith.constant 0 : index
    %12 = vector.load %arg5[%c0_9, %c0_10] : memref<1x128xbf16, #tpu.memory_space<vmem>>, vector<1x128xbf16>
    %13 = arith.extf %12 : vector<1x128xbf16> to vector<1x128xf32>
    %14 = vector.broadcast %13 : vector<1x128xf32> to vector<8x128xf32>
    %15 = arith.addf %11, %14 : vector<8x128xf32>
    %c0_11 = arith.constant 0 : index
    %c0_12 = arith.constant 0 : index
    %16 = vector.load %arg6[%c0_11, %c0_12] : memref<8x128xf32, #tpu.memory_space<vmem>>, vector<8x128xf32>
    tpu.vector_store %arg6[%c0_11, %c0_12], %15 {strides = array<i32>} : memref<8x128xf32, #tpu.memory_space<vmem>>, vector<8x128xf32>,
    return
  }
  func.func @transform_0(%arg0: i32) -> (i32, i32) {
    %c0_i32 = arith.constant 0 : i32
    %c0_i32_0 = arith.constant 0 : i32
    return %arg0, %c0_i32 : i32, i32
  }
  func.func @transform_1(%arg0: i32) -> (i32, i32) {
    %c0_i32 = arith.constant 0 : i32
    %c0_i32_0 = arith.constant 0 : i32
    %c0_i32_1 = arith.constant 0 : i32
    return %c0_i32, %c0_i32_0 : i32, i32
  }
  func.func @transform_2(%arg0: i32) -> (i32, i32) {
    %c0_i32 = arith.constant 0 : i32
    %c0_i32_0 = arith.constant 0 : i32
    %c0_i32_1 = arith.constant 0 : i32
    return %c0_i32, %c0_i32_0 : i32, i32
  }
  func.func @transform_3(%arg0: i32) -> (i32, i32) {
    %c0_i32 = arith.constant 0 : i32
    %c0_i32_0 = arith.constant 0 : i32
    %c0_i32_1 = arith.constant 0 : i32
    return %c0_i32, %c0_i32_0 : i32, i32
  }
  func.func @transform_4(%arg0: i32) -> (i32, i32) {
    %c0_i32 = arith.constant 0 : i32
    %c0_i32_0 = arith.constant 0 : i32
    %c0_i32_1 = arith.constant 0 : i32
    return %c0_i32, %c0_i32_0 : i32, i32
  }
  func.func @transform_5(%arg0: i32) -> (i32, i32) {
    %c0_i32 = arith.constant 0 : i32
    %c0_i32_0 = arith.constant 0 : i32
    return %arg0, %c0_i32 : i32, i32
  }
}

</mosaic_0001>

<bundles_post_ra>
// kernel: tpu_custom_call.1
= control target key start
LH: loop header
LB: loop body
LE: loop exit
PB: predicated region body
PF: predicated region fallthrough
CT: control target
= control target key end

     0   :  { %10 = vsyncpa [#allocation3], 0  ;;  %s1209_s0 = inlined_call_operand.hbm [shape: bf16[16,128], index: 0, kind: input, shape index: {}]   ;;  %s1210_s1 = inlined_call_operand.hbm [shape: bf16[128,128], index: 1, kind: input, shape index: {}]   ;;  %s1211_s2 = inlined_call_operand.vmem [shape: bf16[1,128], index: 2, kind: input, shape index: {}]   ;;  %s1212_s3 = inlined_call_operand.hbm [shape: bf16[128,128], index: 3, kind: input, shape index: {}]   ;;  %s1213_s4 = inlined_call_operand.vmem [shape: bf16[1,128], index: 4, kind: input, shape index: {}]   ;;  %s1214_s5 = inlined_call_operand.hbm [shape: f32[16,128], index: 5, kind: output, shape index: {}]  }
   0x1   :  { %12 = vsyncpa [#allocation3 + $0x1], 0 }
   0x2   :  { %13 = vsyncpa [#allocation6], 0 }
   0x3   :  { %14 = vsyncpa [#allocation4], 0 }
   0x4   :  { %16 = vsyncpa [#allocation4 + $0x1], 0  ;;  %s970_s18 = smov 0   ;;  %s972_s19 = smov 0  }
   0x5   :  { %s974_s20 = smov 0   ;;  %s976_s21 = smov 0  }
   0x6 LB: > { %s991_s22 = sadd.s32 4294967295, %s930_s21   ;;  %s597_s23 = sadd.s32 4294967294, %s930_s21   ;;  %s930_s21 = sphi %s976_s21, %s1234_s21   ;;  %s926_s20 = sphi %s974_s20, %s1233_s20   ;;  %s922_s19 = sphi %s972_s19, %s1232_s19   ;;  %s918_s18 = sphi %s970_s18, %s1231_s18  }
   0x7   : > { %p42_p0 = scmp.ne.s32.totalorder %s922_s19, %s918_s18  ;;  %p1215_p1 = scmp.eq.s32.totalorder %s991_s22, 0 }
   0x8   : > { %p156_p3 = scmp.eq.s32.totalorder %s597_s23, 1  ;;  %p598_p5 = scmp.ge.s32.totalorder %s930_s21, 1 }
   0x9   : > { %p1000_p4 = por %p1215_p1, %p42_p0  ;;  %p163_p7 = scmp.lt.s32.totalorder %s930_s21, 3 }
   0xa   : > { %p1005_p6 = por %p156_p3, %p42_p0  ;;  %s932_s27 = smov [#allocation5]  }
   0xb   : > { %s1218_s24 = scalar_select %p1000_p4, 1, 0 }
   0xc   : > { %s1219_s25 = scalar_select %p1005_p6, 1, 0 }
   0xd   : > { %p1010_p8 = pnand %p598_p5, %p163_p7  ;;  %s175_s28 = sshll.u32 %s932_s27, 4  ;;  %s1014_s28 = int_to_ptr.vmem [resolvable:$true] %s175_s28 }
   0xe   : > { %s933_s30 = smov [#allocation7]   ;;  %s774_s9 = scalar_lea.hbm %s1210_s1, 1024 }
   0xf   : > { %p699_p9 = pneg %p1010_p8  ;;  %s191_s6 = sshll.u32 %s933_s30, 4  ;;  %s1025_s6 = int_to_ptr.vmem [resolvable:$true] %s191_s6 }
  0x10   : > { %p775_p12 = scmp.ne.s32.totalorder %s1210_s1, %s774_s9  ;;  %p781_p5 = scmp.lt.u32.totalorder %s774_s9, %s1210_s1 }
  0x11   : > { %p1021_p11 = pnand %p699_p9, %p1215_p1 }
  0x13   : > { %p776_p13 = pneg %p1021_p11 }
  0x15   : > { %p777_p0 = pnand %p776_p13, %p775_p12 }
  0x17   : > { %p778_p3 = pneg %p777_p0 }
  0x19   : > { %p783_p7 = pnand %p781_p5, %p778_p3 }
  0x1b   : > { %786 = shalt.err (!%p783_p7)
}
  0x1c   : > { %s787_s14 = scalar_lea.vmem %s1014_s28, 1024  ;;  %p795_p2 = scmp.lt.s32.totalorder %s1014_s28, %s1014_s28 }
  0x1d   : > { %p788_p9 = scmp.ne.s32.totalorder %s1014_s28, %s787_s14  ;;  %p796_p12 = scmp.lt.s32.totalorder %s787_s14, %s787_s14 }
  0x1f   : > { %p790_p10 = pnand %p788_p9, %p776_p13  ;;  %p797_p0 = por %p796_p12, %p795_p2 }
  0x21   : > { %p791_p1 = pneg %p790_p10 }
  0x23   : > { %p798_p6 = pnand %p797_p0, %p791_p1 }
  0x25   : > { %801 = shalt.err (!%p798_p6)
}
  0x26   : > { %s934_s15 = smov 64   ;;  %s935_s16 = smov 4  }
  0x27   : > { %702 = dma.hbm_to_vmem [thread:$0]  (!%p1021_p11), %s1210_s1, 1024, %s1014_s28, [#allocation6], %s934_s15, %s934_s15, %s935_s16  }
  0x28   : > { %s802_s7 = scalar_lea.hbm %s1212_s3, 1024 }
  0x29   : > { %p803_p2 = scmp.ne.s32.totalorder %s1212_s3, %s802_s7  ;;  %p809_p10 = scmp.lt.u32.totalorder %s802_s7, %s1212_s3 }
  0x2b   : > { %p805_p1 = pnand %p803_p2, %p776_p13 }
  0x2d   : > { %p806_p6 = pneg %p805_p1 }
  0x2f   : > { %p811_p3 = pnand %p809_p10, %p806_p6 }
  0x31   : > { %814 = shalt.err (!%p811_p3)
}
  0x32   : > { %s815_s28 = scalar_lea.vmem %s1025_s6, 1024  ;;  %p823_p12 = scmp.lt.s32.totalorder %s1025_s6, %s1025_s6 }
  0x33   : > { %p816_p5 = scmp.ne.s32.totalorder %s1025_s6, %s815_s28  ;;  %p824_p0 = scmp.lt.s32.totalorder %s815_s28, %s815_s28 }
  0x35   : > { %p818_p7 = pnand %p816_p5, %p776_p13  ;;  %p825_p2 = por %p824_p0, %p823_p12 }
  0x37   : > { %p819_p9 = pneg %p818_p7 }
  0x39   : > { %p826_p1 = pnand %p825_p2, %p819_p9 }
  0x3b   : > { %829 = shalt.err (!%p826_p1)
}
  0x3c   : > { %705 = dma.hbm_to_vmem [thread:$0]  (!%p1021_p11), %s1212_s3, 1024, %s1025_s6, [#allocation6], %s934_s15, %s934_s15, %s935_s16  }
  0x3d   : > { %s1080_s14 = sadd.s32 1, %s930_s21   ;;  %s29_s29 = sadd.s32 1, %s926_s20 }
  0x3e   : > { %s26_s17 = ssub.s32 %s930_s21, %s1080_s14  ;;  %p36_p13 = scmp.ne.s32.totalorder %s926_s20, %s922_s19 }
  0x3f   : > { %p27_p6 = scmp.eq.s32.totalorder %s26_s17, 0  ;;  %p37_p10 = scmp.eq.s32.totalorder %s930_s21, 0 }
  0x40   : > { %p1222_p3 = scmp.eq.s32.totalorder %s991_s22, 1  ;;  %p716_p7 = scmp.lt.s32.totalorder %s930_s21, 2 }
  0x41   : > { %s1096_s27 = scalar_select %p27_p6, %s926_s20, %s29_s29  }
  0x42   : > { %p1090_p5 = por %p1222_p3, %p36_p13  ;;  %p38_p9 = por %p37_p10, %p36_p13 }
  0x43   : > { %s208_s30 = sand.u32 1, %s926_s20   ;;  %s603_s6 = sshll.u32 %s930_s21, 6 }
  0x44   : > { %s1223_s23 = scalar_select %p1090_p5, 1, 0 }
  0x45   : > { %s602_s7 = sshll.u32 %s208_s30, 2  ;;  %s1103_s8 = scalar_lea.hbm %s1209_s0, %s603_s6 }
  0x46   : > { %s212_s9 = scalar_lea.vmem [#allocation2], %s602_s7  ;;  %p1107_p11 = pnand %p716_p7, %p38_p9 }
  0x47   : > { %s219_s10 = sshll.u32 %s212_s9, 4  ;;  %s209_s28 = scalar_lea.sflag [#allocation3], %s208_s30  ;;  %s1105_s10 = int_to_ptr.vmem [resolvable:$true] %s219_s10 }
  0x48   : > { %s830_s12 = scalar_lea.hbm %s1103_s8, 64  ;;  %p832_p0 = pneg %p1107_p11 }
  0x49   : > { %p831_p12 = scmp.ne.s32.totalorder %s1103_s8, %s830_s12  ;;  %s835_s17 = scalar_lea.hbm %s1209_s0, 128 }
  0x4a   : > { %p836_p13 = scmp.lt.u32.totalorder %s1103_s8, %s1209_s0  ;;  %p837_p6 = scmp.lt.u32.totalorder %s835_s17, %s830_s12 }
  0x4b   : > { %p833_p2 = pnand %p832_p0, %p831_p12  ;;  %p839_p3 = scmp.lt.u32.totalorder %s830_s12, %s1103_s8 }
  0x4c   : > { %p838_p10 = por %p837_p6, %p836_p13 }
  0x4d   : > { %p834_p1 = pneg %p833_p2 }
  0x4e   : > { %p840_p7 = por %p839_p3, %p838_p10 }
  0x50   : > { %p841_p9 = pnand %p840_p7, %p834_p1 }
  0x52   : > { %844 = shalt.err (!%p841_p9)
}
  0x53   : > { %s845_s30 = scalar_lea.vmem %s1105_s10, 64  ;;  %s936_s15 = smov [#allocation2]  }
  0x54   : > { %p846_p12 = scmp.ne.s32.totalorder %s1105_s10, %s845_s30  ;;  %s850_s16 = sshll.u32 %s936_s15, 4  ;;  %s851_s16 = int_to_ptr.vmem [resolvable:$false] %s850_s16 }
  0x55   : > { %s852_s9 = scalar_lea.vmem %s851_s16, 128  ;;  %p853_p4 = scmp.lt.s32.totalorder %s1105_s10, %s851_s16 }
  0x56   : > { %p848_p2 = pnand %p846_p12, %p832_p0  ;;  %p854_p13 = scmp.lt.s32.totalorder %s852_s9, %s845_s30 }
  0x58   : > { %p849_p5 = pneg %p848_p2  ;;  %p855_p6 = por %p854_p13, %p853_p4 }
  0x5a   : > { %p856_p10 = pnand %p855_p6, %p849_p5 }
  0x5c   : > { %859 = shalt.err (!%p856_p10)
}
  0x5d   : > { %709 = dma.hbm_to_vmem [thread:$0]  (!%p1107_p11), %s1103_s8, 64, %s1105_s10, %s209_s28  }
  0x5e   : > { %228 = sbr.rel (%p1010_p8) target bundleno = 585 (0x249), region = 40  ;;  %s1139_s12 = sand.u32 (!%p1010_p8), 1, %s922_s19  }
  0x5f   : > { %s605_s13 = sshll.u32 (!%p1010_p8), %s1139_s12, 2  ;;  %s231_s29 = scalar_lea.sflag (!%p1010_p8), [#allocation3], %s1139_s12 }
  0x60   : > { %s1143_s17 = scalar_lea.vmem (!%p1010_p8), [#allocation2], %s605_s13  ;;  %p1225_p4 = scmp.ne.s32.totalorder (!%p1010_p8), %s1218_s24, 0 }
  0x65   : > { %905 = dma.done.wait (%p1225_p4), %s231_s29, 64  }
  0x66   : > { %907 = vsyncadd (%p1225_p4), %s231_s29, 4294967232  ;;  %p1226_p5 = scmp.eq.s32.totalorder %s991_s22, 0 }
  0x68   : > { %909 = dma.done.wait (%p1226_p5), [#allocation6], 2048   ;;  %p1227_p8 = pmov %p1226_p5 }
  0x69   : > { %v937_v0 = vmov 0.0   ;;  %vm938_vm0 = vmmov 0   ;;  %v758_v1 = vld [vmem:[#allocation5] sm:$0xff]   ;;  %v759_v2 = vld [vmem:[#allocation5 + $0x8] sm:$0xff]   ;;  %v760_v3 = vld [vmem:[#allocation5 + $0x10] sm:$0xff]   ;;  %v289_v18 = vlaneseq  ;;  %s608_s11 = sshll.u32 %s1139_s12, 3 }
  0x6a   : > { %911 = vsyncadd (%p1227_p8), [#allocation6], 4294965248  ;;  %647 = vmatprep.subr.bf16.mxu0 %v937_v0  ;;  %663 = vmatprep.mubr.msk.bf16.mxu0 %vm938_vm0, %v937_v0  ;;  %v766_v4 = vld [vmem:[#allocation7] sm:$0xff]   ;;  %v761_v5 = vld [vmem:[#allocation5 + $0x18] sm:$0xff]   ;;  %s626_s28 = sshll.u32 %s991_s22, 7  ;;  %s268_s7 = scalar_lea.vmem [#allocation8], %s608_s11 }
  0x6b   : > { %667 = vmatprep.subr.bf16.mxu1 %v937_v0  ;;  %683 = vmatprep.mubr.msk.bf16.mxu1 %vm938_vm0, %v937_v0  ;;  %v767_v6 = vld [vmem:[#allocation7 + $0x8] sm:$0xff]   ;;  %v762_v7 = vld [vmem:[#allocation5 + $0x20] sm:$0xff]   ;;  %v768_v8 = vld [vmem:[#allocation7 + $0x10] sm:$0xff]   ;;  %v290_v19 = vshrl.u32 %v289_v18, 7  ;;  %s508_s6 = sshll.u32 %s268_s7, 4  ;;  %s1165_s16 = scalar_lea.hbm %s1214_s5, %s626_s28  ;;  %s1167_s6 = int_to_ptr.vmem [resolvable:$true] %s508_s6 }
  0x6c   : > { %648 = vmatpush3.bf16.msra.mxu0 %v758_v1  ;;  %668 = vmatpush3.bf16.msra.mxu1 %v766_v4  ;;  %v763_v9 = vld [vmem:[#allocation5 + $0x28] sm:$0xff]   ;;  %v769_v10 = vld [vmem:[#allocation7 + $0x18] sm:$0xff]   ;;  %v764_v11 = vld [vmem:[#allocation5 + $0x30] sm:$0xff]   ;;  %s495_s9 = scalar_lea.sflag [#allocation4], %s1139_s12  ;;  %s860_s22 = scalar_lea.vmem %s1167_s6, 128 }
  0x6d   : > { %649 = vmatprep.subr.bf16.mxu0 %v937_v0  ;;  %669 = vmatprep.subr.bf16.mxu1 %v937_v0  ;;  %v770_v12 = vld [vmem:[#allocation7 + $0x20] sm:$0xff]   ;;  %v765_v13 = vld [vmem:[#allocation5 + $0x38] sm:$0xff]   ;;  %v771_v14 = vld [vmem:[#allocation7 + $0x28] sm:$0xff]   ;;  %v291_v22 = vsub.s32 0, %v290_v19  ;;  %p861_p11 = scmp.ne.s32.totalorder %s1167_s6, %s860_s22  ;;  %p1228_p0 = scmp.ne.s32.totalorder %s1223_s23, 0 }
  0x6e   : > { %v270_v15 = vld [vmem:[%s1143_s17] sm:$0xf]  ;;  %v772_v16 = vld [vmem:[#allocation7 + $0x30] sm:$0xff]   ;;  %s939_s13 = smov [#allocation8]  }
  0x6f   : > { %v773_v17 = vld [vmem:[#allocation7 + $0x38] sm:$0xff]   ;;  %p862_p1 = pnand %p861_p11, %p1228_p0  ;;  %s864_s29 = sshll.u32 %s939_s13, 4  ;;  %s865_s29 = int_to_ptr.vmem [resolvable:$false] %s864_s29 }
  0x70   : > { %650 = vmatpush3.bf16.msra.mxu0 %v759_v2  ;;  %670 = vmatpush3.bf16.msra.mxu1 %v767_v6  ;;  %v287_v20 = vld [vmem:[%s1211_s2] sm:$0x1]  ;;  %s866_s17 = scalar_lea.vmem %s865_s29, 256  ;;  %p867_p7 = scmp.lt.s32.totalorder %s1167_s6, %s865_s29 }
  0x71   : > { %651 = vmatprep.subr.bf16.mxu0 %v937_v0  ;;  %671 = vmatprep.subr.bf16.mxu1 %v937_v0  ;;  %v288_v21 = vunpack.c.l.bf16 %v287_v20  ;;  %v399_v31 = vld [vmem:[%s1213_s4] sm:$0x1]  ;;  %p863_p3 = pneg %p862_p1  ;;  %p868_p9 = scmp.lt.s32.totalorder %s866_s17, %s860_s22 }
  0x72   : > { %v400_v32 = vunpack.c.l.bf16 %v399_v31 }
  0x73   : > { %v292_v23 = vrot.slane %v288_v21, %v291_v22  ;;  %p869_p12 = por %p868_p9, %p867_p7 }
  0x74   : > { %652 = vmatpush3.bf16.msra.mxu0 %v760_v3  ;;  %672 = vmatpush3.bf16.msra.mxu1 %v768_v8  ;;  %v404_v33 = vrot.slane %v400_v32, %v291_v22 }
  0x75   : > { %653 = vmatprep.subr.bf16.mxu0 %v937_v0  ;;  %673 = vmatprep.subr.bf16.mxu1 %v937_v0  ;;  %p870_p2 = pnand %p869_p12, %p863_p3 }
  0x78   : > { %654 = vmatpush3.bf16.msra.mxu0 %v761_v5  ;;  %674 = vmatpush3.bf16.msra.mxu1 %v769_v10 }
  0x79   : > { %655 = vmatprep.subr.bf16.mxu0 %v937_v0  ;;  %675 = vmatprep.subr.bf16.mxu1 %v937_v0 }
  0x7c   : > { %656 = vmatpush3.bf16.msra.mxu0 %v762_v7  ;;  %676 = vmatpush3.bf16.msra.mxu1 %v770_v12 }
  0x7d   : > { %657 = vmatprep.subr.bf16.mxu0 %v937_v0  ;;  %677 = vmatprep.subr.bf16.mxu1 %v937_v0 }
  0x80   : > { %658 = vmatpush3.bf16.msra.mxu0 %v763_v9  ;;  %678 = vmatpush3.bf16.msra.mxu1 %v771_v14 }
  0x81   : > { %659 = vmatprep.subr.bf16.mxu0 %v937_v0  ;;  %679 = vmatprep.subr.bf16.mxu1 %v937_v0 }
  0x84   : > { %660 = vmatpush3.bf16.msra.mxu0 %v764_v11  ;;  %680 = vmatpush3.bf16.msra.mxu1 %v772_v16 }
  0x85   : > { %661 = vmatprep.subr.bf16.mxu0 %v937_v0  ;;  %681 = vmatprep.subr.bf16.mxu1 %v937_v0 }
  0x88   : > { %662 = vmatpush3.bf16.msra.mxu0 %v765_v13  ;;  %682 = vmatpush3.bf16.msra.mxu1 %v773_v17 }
  0x8b   : > { %664 = vmatmul.mubr.bf16.vlgmr.msra.gmra.mrb[0].mxu0 %v270_v15 }
 0x15e   : > { %v375_v24 = vpop.f32.mrb[0].mxu0 }
 0x15f   : > { %v376_v25 = vadd.f32 %v375_v24, %v292_v23  ;;  %v665_v26 = vpop.f32.mrb[1].mxu0 }
 0x160   : > { %v378_v27 = vpop.f32.mrb[2].mxu0 }
 0x161   : > { %v381_v28 = vmax.f32 %v376_v25, 0.0  ;;  %v666_v29 = vpop.f32.mrb[3].mxu0 }
 0x163   : > { %v382_v30 = vpack.c.bf16 %v381_v28, %v381_v28 }
 0x165   : > { %684 = vmatmul.mubr.bf16.vlgmr.msra.gmra.mrb[0].mxu1 %v382_v30 }
 0x238   : > { %v487_v34 = vpop.f32.mrb[0].mxu1 }
 0x239   : > { %v488_v35 = vadd.f32 %v487_v34, %v404_v33  ;;  %v685_v36 = vpop.f32.mrb[1].mxu1 }
 0x23a   : > { %v490_v37 = vpop.f32.mrb[2].mxu1 }
 0x23b   : > { %493 = vst [vmem:[%s268_s7] sm:$0xff] %v488_v35  ;;  %v686_v38 = vpop.f32.mrb[3].mxu1 }
 0x23c   : > { %873 = shalt.err (!%p870_p2)
}
 0x23d   : > { %s874_s12 = scalar_lea.hbm %s1165_s16, 128  ;;  %s878_s8 = scalar_lea.hbm %s1214_s5, 256 }
 0x23e   : > { %p875_p13 = scmp.ne.s32.totalorder %s1165_s16, %s874_s12  ;;  %p879_p4 = scmp.lt.u32.totalorder %s1165_s16, %s1214_s5 }
 0x23f   : > { %p880_p5 = scmp.lt.u32.totalorder %s878_s8, %s874_s12  ;;  %p882_p11 = scmp.lt.u32.totalorder %s874_s12, %s1165_s16 }
 0x240   : > { %p876_p6 = pnand %p875_p13, %p1228_p0 }
 0x241   : > { %p881_p8 = por %p880_p5, %p879_p4 }
 0x242   : > { %p877_p10 = pneg %p876_p6 }
 0x243   : > { %p883_p1 = por %p882_p11, %p881_p8 }
 0x245   : > { %p884_p3 = pnand %p883_p1, %p877_p10 }
 0x247   : > { %887 = shalt.err (!%p884_p3)
}
 0x248   : > { %697 = dma.vmem_to_hbm [thread:$0]  (%p1228_p0), %s1167_s6, 128, %s1165_s16, %s495_s9  }
 0x249 PF: > { %s520_s28 = sand.u32 1, %s918_s18   ;;  %p1229_p7 = scmp.ne.s32.totalorder %s1219_s25, 0 }
 0x24a   : > { %p1230_p9 = scmp.ge.s32.totalorder %s930_s21, 2  ;;  %s521_s7 = scalar_lea.sflag [#allocation4], %s520_s28 }
 0x24c   : > { %p711_p12 = pnand %p1230_p9, %p1229_p7 }
 0x24e   : > { %913 = dma.done.wait (!%p711_p12), %s521_s7, 128  }
 0x24f   : > { %915 = vsyncadd (!%p711_p12), %s521_s7, 4294967168  ;;  %p19_p2 = scmp.ge.s32.totalorder %s1080_s14, 4   ;;  %s1231_s18 = smov %s922_s19 }
 0x250   : > { %s1232_s19 = smov %s926_s20  ;;  %s1233_s20 = smov %s1096_s27 }
 0x251   : > { %s1234_s21 = smov %s1080_s14  ;;  %21 = sbr.rel (!%p19_p2) target bundleno = 6 (0x6), region = 93 }
 0x258   :  { %526 = vsyncpa [#allocation3], 1 }
 0x259   :  { %528 = vsyncpa [#allocation3 + $0x1], 1 }
 0x25a   :  { %529 = vsyncpa [#allocation6], 1 }
 0x25b   :  { %530 = vsyncpa [#allocation4], 1 }
 0x25c   :  { %532 = vsyncpa [#allocation4 + $0x1], 1 }

// kernel: tpu_custom_call.1
= control target key start
LH: loop header
LB: loop body
LE: loop exit
PB: predicated region body
PF: predicated region fallthrough
CT: control target
= control target key end

     0   :  { %10 = vsyncpa [#allocation3], 0  ;;  %s1209_s0 = inlined_call_operand.hbm [shape: bf16[16,128], index: 0, kind: input, shape index: {}]   ;;  %s1210_s1 = inlined_call_operand.hbm [shape: bf16[128,128], index: 1, kind: input, shape index: {}]   ;;  %s1211_s2 = inlined_call_operand.vmem [shape: bf16[1,128], index: 2, kind: input, shape index: {}]   ;;  %s1212_s3 = inlined_call_operand.hbm [shape: bf16[128,128], index: 3, kind: input, shape index: {}]   ;;  %s1213_s4 = inlined_call_operand.vmem [shape: bf16[1,128], index: 4, kind: input, shape index: {}]   ;;  %s1214_s5 = inlined_call_operand.hbm [shape: f32[16,128], index: 5, kind: output, shape index: {}]  }
   0x1   :  { %12 = vsyncpa [#allocation3 + $0x1], 0 }
   0x2   :  { %13 = vsyncpa [#allocation6], 0 }
   0x3   :  { %14 = vsyncpa [#allocation4], 0 }
   0x4   :  { %16 = vsyncpa [#allocation4 + $0x1], 0  ;;  %s970_s18 = smov 0   ;;  %s972_s19 = smov 0  }
   0x5   :  { %s974_s20 = smov 0   ;;  %s976_s21 = smov 0  }
   0x6 LB: > { %s991_s22 = sadd.s32 4294967295, %s930_s21   ;;  %s597_s23 = sadd.s32 4294967294, %s930_s21   ;;  %s930_s21 = sphi %s976_s21, %s1234_s21   ;;  %s926_s20 = sphi %s974_s20, %s1233_s20   ;;  %s922_s19 = sphi %s972_s19, %s1232_s19   ;;  %s918_s18 = sphi %s970_s18, %s1231_s18  }
   0x7   : > { %p42_p0 = scmp.ne.s32.totalorder %s922_s19, %s918_s18  ;;  %p1215_p1 = scmp.eq.s32.totalorder %s991_s22, 0 }
   0x8   : > { %p156_p3 = scmp.eq.s32.totalorder %s597_s23, 1  ;;  %p598_p5 = scmp.ge.s32.totalorder %s930_s21, 1 }
   0x9   : > { %p1000_p4 = por %p1215_p1, %p42_p0  ;;  %p163_p7 = scmp.lt.s32.totalorder %s930_s21, 3 }
   0xa   : > { %p1005_p6 = por %p156_p3, %p42_p0  ;;  %s932_s27 = smov [#allocation5]  }
   0xb   : > { %s1218_s24 = scalar_select %p1000_p4, 1, 0 }
   0xc   : > { %s1219_s25 = scalar_select %p1005_p6, 1, 0 }
   0xd   : > { %p1010_p8 = pnand %p598_p5, %p163_p7  ;;  %s175_s28 = sshll.u32 %s932_s27, 4  ;;  %s1014_s28 = int_to_ptr.vmem [resolvable:$true] %s175_s28 }
   0xe   : > { %s933_s30 = smov [#allocation7]   ;;  %s774_s9 = scalar_lea.hbm %s1210_s1, 1024 }
   0xf   : > { %p699_p9 = pneg %p1010_p8  ;;  %s191_s6 = sshll.u32 %s933_s30, 4  ;;  %s1025_s6 = int_to_ptr.vmem [resolvable:$true] %s191_s6 }
  0x10   : > { %p775_p12 = scmp.ne.s32.totalorder %s1210_s1, %s774_s9  ;;  %p781_p5 = scmp.lt.u32.totalorder %s774_s9, %s1210_s1 }
  0x11   : > { %p1021_p11 = pnand %p699_p9, %p1215_p1 }
  0x13   : > { %p776_p13 = pneg %p1021_p11 }
  0x15   : > { %p777_p0 = pnand %p776_p13, %p775_p12 }
  0x17   : > { %p778_p3 = pneg %p777_p0 }
  0x19   : > { %p783_p7 = pnand %p781_p5, %p778_p3 }
  0x1b   : > { %786 = shalt.err (!%p783_p7)
}
  0x1c   : > { %s787_s14 = scalar_lea.vmem %s1014_s28, 1024  ;;  %p795_p2 = scmp.lt.s32.totalorder %s1014_s28, %s1014_s28 }
  0x1d   : > { %p788_p9 = scmp.ne.s32.totalorder %s1014_s28, %s787_s14  ;;  %p796_p12 = scmp.lt.s32.totalorder %s787_s14, %s787_s14 }
  0x1f   : > { %p790_p10 = pnand %p788_p9, %p776_p13  ;;  %p797_p0 = por %p796_p12, %p795_p2 }
  0x21   : > { %p791_p1 = pneg %p790_p10 }
  0x23   : > { %p798_p6 = pnand %p797_p0, %p791_p1 }
  0x25   : > { %801 = shalt.err (!%p798_p6)
}
  0x26   : > { %s934_s15 = smov 64   ;;  %s935_s16 = smov 4  }
  0x27   : > { %702 = dma.hbm_to_vmem [thread:$0]  (!%p1021_p11), %s1210_s1, 1024, %s1014_s28, [#allocation6], %s934_s15, %s934_s15, %s935_s16  }
  0x28   : > { %s802_s7 = scalar_lea.hbm %s1212_s3, 1024 }
  0x29   : > { %p803_p2 = scmp.ne.s32.totalorder %s1212_s3, %s802_s7  ;;  %p809_p10 = scmp.lt.u32.totalorder %s802_s7, %s1212_s3 }
  0x2b   : > { %p805_p1 = pnand %p803_p2, %p776_p13 }
  0x2d   : > { %p806_p6 = pneg %p805_p1 }
  0x2f   : > { %p811_p3 = pnand %p809_p10, %p806_p6 }
  0x31   : > { %814 = shalt.err (!%p811_p3)
}
  0x32   : > { %s815_s28 = scalar_lea.vmem %s1025_s6, 1024  ;;  %p823_p12 = scmp.lt.s32.totalorder %s1025_s6, %s1025_s6 }
  0x33   : > { %p816_p5 = scmp.ne.s32.totalorder %s1025_s6, %s815_s28  ;;  %p824_p0 = scmp.lt.s32.totalorder %s815_s28, %s815_s28 }
  0x35   : > { %p818_p7 = pnand %p816_p5, %p776_p13  ;;  %p825_p2 = por %p824_p0, %p823_p12 }
  0x37   : > { %p819_p9 = pneg %p818_p7 }
  0x39   : > { %p826_p1 = pnand %p825_p2, %p819_p9 }
  0x3b   : > { %829 = shalt.err (!%p826_p1)
}
  0x3c   : > { %705 = dma.hbm_to_vmem [thread:$0]  (!%p1021_p11), %s1212_s3, 1024, %s1025_s6, [#allocation6], %s934_s15, %s934_s15, %s935_s16  }
  0x3d   : > { %s1080_s14 = sadd.s32 1, %s930_s21   ;;  %s29_s29 = sadd.s32 1, %s926_s20 }
  0x3e   : > { %s26_s17 = ssub.s32 %s930_s21, %s1080_s14  ;;  %p36_p13 = scmp.ne.s32.totalorder %s926_s20, %s922_s19 }
  0x3f   : > { %p27_p6 = scmp.eq.s32.totalorder %s26_s17, 0  ;;  %p37_p10 = scmp.eq.s32.totalorder %s930_s21, 0 }
  0x40   : > { %p1222_p3 = scmp.eq.s32.totalorder %s991_s22, 1  ;;  %p716_p7 = scmp.lt.s32.totalorder %s930_s21, 2 }
  0x41   : > { %s1096_s27 = scalar_select %p27_p6, %s926_s20, %s29_s29  }
  0x42   : > { %p1090_p5 = por %p1222_p3, %p36_p13  ;;  %p38_p9 = por %p37_p10, %p36_p13 }
  0x43   : > { %s208_s30 = sand.u32 1, %s926_s20   ;;  %s603_s6 = sshll.u32 %s930_s21, 6 }
  0x44   : > { %s1223_s23 = scalar_select %p1090_p5, 1, 0 }
  0x45   : > { %s602_s7 = sshll.u32 %s208_s30, 2  ;;  %s1103_s8 = scalar_lea.hbm %s1209_s0, %s603_s6 }
  0x46   : > { %s212_s9 = scalar_lea.vmem [#allocation2], %s602_s7  ;;  %p1107_p11 = pnand %p716_p7, %p38_p9 }
  0x47   : > { %s219_s10 = sshll.u32 %s212_s9, 4  ;;  %s209_s28 = scalar_lea.sflag [#allocation3], %s208_s30  ;;  %s1105_s10 = int_to_ptr.vmem [resolvable:$true] %s219_s10 }
  0x48   : > { %s830_s12 = scalar_lea.hbm %s1103_s8, 64  ;;  %p832_p0 = pneg %p1107_p11 }
  0x49   : > { %p831_p12 = scmp.ne.s32.totalorder %s1103_s8, %s830_s12  ;;  %s835_s17 = scalar_lea.hbm %s1209_s0, 128 }
  0x4a   : > { %p836_p13 = scmp.lt.u32.totalorder %s1103_s8, %s1209_s0  ;;  %p837_p6 = scmp.lt.u32.totalorder %s835_s17, %s830_s12 }
  0x4b   : > { %p833_p2 = pnand %p832_p0, %p831_p12  ;;  %p839_p3 = scmp.lt.u32.totalorder %s830_s12, %s1103_s8 }
  0x4c   : > { %p838_p10 = por %p837_p6, %p836_p13 }
  0x4d   : > { %p834_p1 = pneg %p833_p2 }
  0x4e   : > { %p840_p7 = por %p839_p3, %p838_p10 }
  0x50   : > { %p841_p9 = pnand %p840_p7, %p834_p1 }
  0x52   : > { %844 = shalt.err (!%p841_p9)
}
  0x53   : > { %s845_s30 = scalar_lea.vmem %s1105_s10, 64  ;;  %s936_s15 = smov [#allocation2]  }
  0x54   : > { %p846_p12 = scmp.ne.s32.totalorder %s1105_s10, %s845_s30  ;;  %s850_s16 = sshll.u32 %s936_s15, 4  ;;  %s851_s16 = int_to_ptr.vmem [resolvable:$false] %s850_s16 }
  0x55   : > { %s852_s9 = scalar_lea.vmem %s851_s16, 128  ;;  %p853_p4 = scmp.lt.s32.totalorder %s1105_s10, %s851_s16 }
  0x56   : > { %p848_p2 = pnand %p846_p12, %p832_p0  ;;  %p854_p13 = scmp.lt.s32.totalorder %s852_s9, %s845_s30 }
  0x58   : > { %p849_p5 = pneg %p848_p2  ;;  %p855_p6 = por %p854_p13, %p853_p4 }
  0x5a   : > { %p856_p10 = pnand %p855_p6, %p849_p5 }
  0x5c   : > { %859 = shalt.err (!%p856_p10)
}
  0x5d   : > { %709 = dma.hbm_to_vmem [thread:$0]  (!%p1107_p11), %s1103_s8, 64, %s1105_s10, %s209_s28  }
  0x5e   : > { %228 = sbr.rel (%p1010_p8) target bundleno = 585 (0x249), region = 40  ;;  %s1139_s12 = sand.u32 (!%p1010_p8), 1, %s922_s19  }
  0x5f   : > { %s605_s13 = sshll.u32 (!%p1010_p8), %s1139_s12, 2  ;;  %s231_s29 = scalar_lea.sflag (!%p1010_p8), [#allocation3], %s1139_s12 }
  0x60   : > { %s1143_s17 = scalar_lea.vmem (!%p1010_p8), [#allocation2], %s605_s13  ;;  %p1225_p4 = scmp.ne.s32.totalorder (!%p1010_p8), %s1218_s24, 0 }
  0x65   : > { %905 = dma.done.wait (%p1225_p4), %s231_s29, 64  }
  0x66   : > { %907 = vsyncadd (%p1225_p4), %s231_s29, 4294967232  ;;  %p1226_p5 = scmp.eq.s32.totalorder %s991_s22, 0 }
  0x68   : > { %909 = dma.done.wait (%p1226_p5), [#allocation6], 2048   ;;  %p1227_p8 = pmov %p1226_p5 }
  0x69   : > { %v937_v0 = vmov 0.0   ;;  %vm938_vm0 = vmmov 0   ;;  %v758_v1 = vld [vmem:[#allocation5] sm:$0xff]   ;;  %v759_v2 = vld [vmem:[#allocation5 + $0x8] sm:$0xff]   ;;  %v760_v3 = vld [vmem:[#allocation5 + $0x10] sm:$0xff]   ;;  %v289_v18 = vlaneseq  ;;  %s608_s11 = sshll.u32 %s1139_s12, 3 }
  0x6a   : > { %911 = vsyncadd (%p1227_p8), [#allocation6], 4294965248  ;;  %647 = vmatprep.subr.bf16.mxu0 %v937_v0  ;;  %663 = vmatprep.mubr.msk.bf16.mxu0 %vm938_vm0, %v937_v0  ;;  %v766_v4 = vld [vmem:[#allocation7] sm:$0xff]   ;;  %v761_v5 = vld [vmem:[#allocation5 + $0x18] sm:$0xff]   ;;  %s626_s28 = sshll.u32 %s991_s22, 7  ;;  %s268_s7 = scalar_lea.vmem [#allocation8], %s608_s11 }
  0x6b   : > { %667 = vmatprep.subr.bf16.mxu1 %v937_v0  ;;  %683 = vmatprep.mubr.msk.bf16.mxu1 %vm938_vm0, %v937_v0  ;;  %v767_v6 = vld [vmem:[#allocation7 + $0x8] sm:$0xff]   ;;  %v762_v7 = vld [vmem:[#allocation5 + $0x20] sm:$0xff]   ;;  %v768_v8 = vld [vmem:[#allocation7 + $0x10] sm:$0xff]   ;;  %v290_v19 = vshrl.u32 %v289_v18, 7  ;;  %s508_s6 = sshll.u32 %s268_s7, 4  ;;  %s1165_s16 = scalar_lea.hbm %s1214_s5, %s626_s28  ;;  %s1167_s6 = int_to_ptr.vmem [resolvable:$true] %s508_s6 }
  0x6c   : > { %648 = vmatpush3.bf16.msra.mxu0 %v758_v1  ;;  %668 = vmatpush3.bf16.msra.mxu1 %v766_v4  ;;  %v763_v9 = vld [vmem:[#allocation5 + $0x28] sm:$0xff]   ;;  %v769_v10 = vld [vmem:[#allocation7 + $0x18] sm:$0xff]   ;;  %v764_v11 = vld [vmem:[#allocation5 + $0x30] sm:$0xff]   ;;  %s495_s9 = scalar_lea.sflag [#allocation4], %s1139_s12  ;;  %s860_s22 = scalar_lea.vmem %s1167_s6, 128 }
  0x6d   : > { %649 = vmatprep.subr.bf16.mxu0 %v937_v0  ;;  %669 = vmatprep.subr.bf16.mxu1 %v937_v0  ;;  %v770_v12 = vld [vmem:[#allocation7 + $0x20] sm:$0xff]   ;;  %v765_v13 = vld [vmem:[#allocation5 + $0x38] sm:$0xff]   ;;  %v771_v14 = vld [vmem:[#allocation7 + $0x28] sm:$0xff]   ;;  %v291_v22 = vsub.s32 0, %v290_v19  ;;  %p861_p11 = scmp.ne.s32.totalorder %s1167_s6, %s860_s22  ;;  %p1228_p0 = scmp.ne.s32.totalorder %s1223_s23, 0 }
  0x6e   : > { %v270_v15 = vld [vmem:[%s1143_s17] sm:$0xf]  ;;  %v772_v16 = vld [vmem:[#allocation7 + $0x30] sm:$0xff]   ;;  %s939_s13 = smov [#allocation8]  }
  0x6f   : > { %v773_v17 = vld [vmem:[#allocation7 + $0x38] sm:$0xff]   ;;  %p862_p1 = pnand %p861_p11, %p1228_p0  ;;  %s864_s29 = sshll.u32 %s939_s13, 4  ;;  %s865_s29 = int_to_ptr.vmem [resolvable:$false] %s864_s29 }
  0x70   : > { %650 = vmatpush3.bf16.msra.mxu0 %v759_v2  ;;  %670 = vmatpush3.bf16.msra.mxu1 %v767_v6  ;;  %v287_v20 = vld [vmem:[%s1211_s2] sm:$0x1]  ;;  %s866_s17 = scalar_lea.vmem %s865_s29, 256  ;;  %p867_p7 = scmp.lt.s32.totalorder %s1167_s6, %s865_s29 }
  0x71   : > { %651 = vmatprep.subr.bf16.mxu0 %v937_v0  ;;  %671 = vmatprep.subr.bf16.mxu1 %v937_v0  ;;  %v288_v21 = vunpack.c.l.bf16 %v287_v20  ;;  %v399_v31 = vld [vmem:[%s1213_s4] sm:$0x1]  ;;  %p863_p3 = pneg %p862_p1  ;;  %p868_p9 = scmp.lt.s32.totalorder %s866_s17, %s860_s22 }
  0x72   : > { %v400_v32 = vunpack.c.l.bf16 %v399_v31 }
  0x73   : > { %v292_v23 = vrot.slane %v288_v21, %v291_v22  ;;  %p869_p12 = por %p868_p9, %p867_p7 }
  0x74   : > { %652 = vmatpush3.bf16.msra.mxu0 %v760_v3  ;;  %672 = vmatpush3.bf16.msra.mxu1 %v768_v8  ;;  %v404_v33 = vrot.slane %v400_v32, %v291_v22 }
  0x75   : > { %653 = vmatprep.subr.bf16.mxu0 %v937_v0  ;;  %673 = vmatprep.subr.bf16.mxu1 %v937_v0  ;;  %p870_p2 = pnand %p869_p12, %p863_p3 }
  0x78   : > { %654 = vmatpush3.bf16.msra.mxu0 %v761_v5  ;;  %674 = vmatpush3.bf16.msra.mxu1 %v769_v10 }
  0x79   : > { %655 = vmatprep.subr.bf16.mxu0 %v937_v0  ;;  %675 = vmatprep.subr.bf16.mxu1 %v937_v0 }
  0x7c   : > { %656 = vmatpush3.bf16.msra.mxu0 %v762_v7  ;;  %676 = vmatpush3.bf16.msra.mxu1 %v770_v12 }
  0x7d   : > { %657 = vmatprep.subr.bf16.mxu0 %v937_v0  ;;  %677 = vmatprep.subr.bf16.mxu1 %v937_v0 }
  0x80   : > { %658 = vmatpush3.bf16.msra.mxu0 %v763_v9  ;;  %678 = vmatpush3.bf16.msra.mxu1 %v771_v14 }
  0x81   : > { %659 = vmatprep.subr.bf16.mxu0 %v937_v0  ;;  %679 = vmatprep.subr.bf16.mxu1 %v937_v0 }
  0x84   : > { %660 = vmatpush3.bf16.msra.mxu0 %v764_v11  ;;  %680 = vmatpush3.bf16.msra.mxu1 %v772_v16 }
  0x85   : > { %661 = vmatprep.subr.bf16.mxu0 %v937_v0  ;;  %681 = vmatprep.subr.bf16.mxu1 %v937_v0 }
  0x88   : > { %662 = vmatpush3.bf16.msra.mxu0 %v765_v13  ;;  %682 = vmatpush3.bf16.msra.mxu1 %v773_v17 }
  0x8b   : > { %664 = vmatmul.mubr.bf16.vlgmr.msra.gmra.mrb[0].mxu0 %v270_v15 }
 0x15e   : > { %v375_v24 = vpop.f32.mrb[0].mxu0 }
 0x15f   : > { %v376_v25 = vadd.f32 %v375_v24, %v292_v23  ;;  %v665_v26 = vpop.f32.mrb[1].mxu0 }
 0x160   : > { %v378_v27 = vpop.f32.mrb[2].mxu0 }
 0x161   : > { %v381_v28 = vmax.f32 %v376_v25, 0.0  ;;  %v666_v29 = vpop.f32.mrb[3].mxu0 }
 0x163   : > { %v382_v30 = vpack.c.bf16 %v381_v28, %v381_v28 }
 0x165   : > { %684 = vmatmul.mubr.bf16.vlgmr.msra.gmra.mrb[0].mxu1 %v382_v30 }
 0x238   : > { %v487_v34 = vpop.f32.mrb[0].mxu1 }
 0x239   : > { %v488_v35 = vadd.f32 %v487_v34, %v404_v33  ;;  %v685_v36 = vpop.f32.mrb[1].mxu1 }
 0x23a   : > { %v490_v37 = vpop.f32.mrb[2].mxu1 }
 0x23b   : > { %493 = vst [vmem:[%s268_s7] sm:$0xff] %v488_v35  ;;  %v686_v38 = vpop.f32.mrb[3].mxu1 }
 0x23c   : > { %873 = shalt.err (!%p870_p2)
}
 0x23d   : > { %s874_s12 = scalar_lea.hbm %s1165_s16, 128  ;;  %s878_s8 = scalar_lea.hbm %s1214_s5, 256 }
 0x23e   : > { %p875_p13 = scmp.ne.s32.totalorder %s1165_s16, %s874_s12  ;;  %p879_p4 = scmp.lt.u32.totalorder %s1165_s16, %s1214_s5 }
 0x23f   : > { %p880_p5 = scmp.lt.u32.totalorder %s878_s8, %s874_s12  ;;  %p882_p11 = scmp.lt.u32.totalorder %s874_s12, %s1165_s16 }
 0x240   : > { %p876_p6 = pnand %p875_p13, %p1228_p0 }
 0x241   : > { %p881_p8 = por %p880_p5, %p879_p4 }
 0x242   : > { %p877_p10 = pneg %p876_p6 }
 0x243   : > { %p883_p1 = por %p882_p11, %p881_p8 }
 0x245   : > { %p884_p3 = pnand %p883_p1, %p877_p10 }
 0x247   : > { %887 = shalt.err (!%p884_p3)
}
 0x248   : > { %697 = dma.vmem_to_hbm [thread:$0]  (%p1228_p0), %s1167_s6, 128, %s1165_s16, %s495_s9  }
 0x249 PF: > { %s520_s28 = sand.u32 1, %s918_s18   ;;  %p1229_p7 = scmp.ne.s32.totalorder %s1219_s25, 0 }
 0x24a   : > { %p1230_p9 = scmp.ge.s32.totalorder %s930_s21, 2  ;;  %s521_s7 = scalar_lea.sflag [#allocation4], %s520_s28 }
 0x24c   : > { %p711_p12 = pnand %p1230_p9, %p1229_p7 }
 0x24e   : > { %913 = dma.done.wait (!%p711_p12), %s521_s7, 128  }
 0x24f   : > { %915 = vsyncadd (!%p711_p12), %s521_s7, 4294967168  ;;  %p19_p2 = scmp.ge.s32.totalorder %s1080_s14, 4   ;;  %s1231_s18 = smov %s922_s19 }
 0x250   : > { %s1232_s19 = smov %s926_s20  ;;  %s1233_s20 = smov %s1096_s27 }
 0x251   : > { %s1234_s21 = smov %s1080_s14  ;;  %21 = sbr.rel (!%p19_p2) target bundleno = 6 (0x6), region = 93 }
 0x258   :  { %526 = vsyncpa [#allocation3], 1 }
 0x259   :  { %528 = vsyncpa [#allocation3 + $0x1], 1 }
 0x25a   :  { %529 = vsyncpa [#allocation6], 1 }
 0x25b   :  { %530 = vsyncpa [#allocation4], 1 }
 0x25c   :  { %532 = vsyncpa [#allocation4 + $0x1], 1 }

</bundles_post_ra>
